<compile_context>
chip_gen: v7x
topology: tpu7x:2x2x1
jax: 0.10.0
libtpu: 0.0.40
codegen_flags: <defaults>
</compile_context>

<pallas_src>
import functools

import jax
import jax.numpy as jnp
from jax.experimental import pallas as pl
from jax.experimental.pallas import tpu as pltpu


def _pre_extraction_kernel(x_ref, wt_ref, bt_ref, w1_ref, b1_ref,
                           w2_ref, b2_ref, o_ref, *, s, pack):
    """One grid step = `tg` packed groups, each packing `pack` lane blocks.

    x_ref : [pack, tg*s, d]    bf16; lane block j <-> group j*B4 + q
    wt_ref: [pack, d, pack*C]  bf16; transfer weight placed in lane block j
    bt_ref: [1, pack*C]        f32 (bias tiled pack times)
    w1_ref: [pack*C, pack*H]   bf16 block-diagonal
    b1_ref: [1, pack*H]        f32
    w2_ref: [pack*H, pack*C]   bf16 block-diagonal
    b2_ref: [1, pack*C]        f32
    o_ref : [tg, pack*C]       f32; per-packed-group max over the s positions
    """
    # transfer: Conv1d(k=1) + BN + ReLU.  One small matmul per lane block,
    # accumulated in f32 (off-block weight entries are exactly zero).
    h = jnp.dot(x_ref[0], wt_ref[0], preferred_element_type=jnp.float32)
    for j in range(1, pack):
        h = h + jnp.dot(x_ref[j], wt_ref[j], preferred_element_type=jnp.float32)
    h = jnp.maximum(h + bt_ref[...], 0.0)               # [M, pack*C] f32

    # ConvBNReLURes1D (blocks=1, groups=1, res_expansion=1): block-diagonal
    # weights keep the `pack` lane blocks independent.
    h1 = jnp.dot(h.astype(jnp.bfloat16), w1_ref[...],
                 preferred_element_type=jnp.float32)
    h1 = jnp.maximum(h1 + b1_ref[...], 0.0)              # [M, pack*H]
    h2 = jnp.dot(h1.astype(jnp.bfloat16), w2_ref[...],
                 preferred_element_type=jnp.float32)
    y = jnp.maximum(h2 + b2_ref[...] + h, 0.0)           # act(net2(net1(x)) + x)

    # adaptive_max_pool1d(., 1): max over the s positions of each group.
    # s % 8 == 0 (asserted in the wrapper) keeps this reshape on (8,128)
    # tile boundaries — a free sublane reinterpretation, no relayout.
    m, cw = y.shape
    o_ref[...] = jnp.max(y.reshape(m // s, s, cw), axis=1)


def _choose_packs_per_step(n_packs, s, *, target_rows=4096, max_packs=1024):
    """Packed groups per grid step.

    Target ~4096 packed [*,128] rows per step (amortizes the ~0.35us/step
    pipeline overhead, real MXU M), capped so the double-buffered VMEM
    footprint stays comfortably inside v7x's 64 MiB physical VMEM.
    """
    tg = max(1, target_rows // s)
    tg = min(tg, max_packs)
    if tg >= n_packs:
        return n_packs                 # single step: block == full array
    tg8 = (tg // 8) * 8                # multi-step: 8-aligned output tile
    if tg8 == 0:
        return min(8, n_packs)
    return tg8


def _fold_bn(w, b, gamma, beta, mean, var, eps=1e-5):
    """Fold eval-mode BatchNorm1d into a 1x1 conv. w: [Cin, Cout], b: [Cout]."""
    scale = gamma / jnp.sqrt(var + eps)            # [Cout]
    w_eff = w * scale[None, :]
    b_eff = b * scale + (beta - mean * scale)
    return w_eff, b_eff                            # bias 1-D [Cout]


def pre_extraction_forward(x, params):
    """x: [b, n, s, d] float32 -> [b, out_channels, n] float32."""
    b, n, s, d = x.shape
    if s % 8 != 0:
        raise ValueError(f"s={s} must be a multiple of 8 (aligned pooling reshape)")
    wt, bt = params["wt"], params["bt"]
    w1, b1 = params["w1"], params["b1"]
    w2, b2 = params["w2"], params["b2"]
    c_out = wt.shape[1]
    hid = w1.shape[1]

    # Lane-packing factor: how many groups share one 128-lane row.
    pack = 128 // c_out if (c_out <= 128 and 128 % c_out == 0) else 1

    B = b * n
    n_packs = pl.cdiv(B, pack)
    tg = _choose_packs_per_step(n_packs, s)
    n_blocks = pl.cdiv(n_packs, tg)
    n_packs_pad = n_blocks * tg
    b_tot = pack * n_packs_pad

    # Packed input is a FREE reshape of x: group g = j*n_packs_pad + q maps
    # to lane block j of packed group q.  Cast to bf16 in the wrapper
    # (matmuls are bf16 anyway; halves HBM read + the lane-padded VMEM tile).
    xr = x.reshape(B, s, d).astype(jnp.bfloat16)
    if b_tot != B:
        xr = jnp.pad(xr, ((0, b_tot - B), (0, 0), (0, 0)))
    x4 = xr.reshape(pack, n_packs_pad * s, d)

    cw = pack * c_out           # packed lane width of h / output (128 at C=32)
    hw = pack * hid             # packed lane width of the hidden activation

    eye = jnp.eye(pack, dtype=wt.dtype)
    # transfer weight, one [d, cw] slice per lane block (wt in block j of slice j)
    wt_p = (eye[:, None, :, None] * wt[None, :, None, :]) \
        .reshape(pack, d, cw).astype(jnp.bfloat16)
    # res-block weights: block-diagonal copies keep the lane blocks independent
    w1_p = jnp.kron(eye, w1).astype(jnp.bfloat16)          # [cw, hw]
    w2_p = jnp.kron(eye, w2).astype(jnp.bfloat16)          # [hw, cw]
    bt_p = jnp.tile(bt, pack).reshape(1, cw).astype(jnp.float32)
    b1_p = jnp.tile(b1, pack).reshape(1, hw).astype(jnp.float32)
    b2_p = jnp.tile(b2, pack).reshape(1, cw).astype(jnp.float32)

    kernel = functools.partial(_pre_extraction_kernel, s=s, pack=pack)

    # Advisory cost for XLA's scheduler (real math, packed/bf16 traffic).
    flops = 2 * b_tot * s * (d * c_out + 2 * c_out * hid)
    bytes_accessed = (x4.size * 2 + n_packs_pad * cw * 4
                      + (wt_p.size + w1_p.size + w2_p.size) * 2
                      + (bt_p.size + b1_p.size + b2_p.size) * 4)

    grid_spec = pltpu.PrefetchScalarGridSpec(
        num_scalar_prefetch=0,
        grid=(n_blocks,),
        in_specs=[
            pl.BlockSpec((pack, tg * s, d), lambda g: (0, g, 0)),
            pl.BlockSpec(wt_p.shape, lambda g: (0, 0, 0)),
            pl.BlockSpec(bt_p.shape, lambda g: (0, 0)),
            pl.BlockSpec(w1_p.shape, lambda g: (0, 0)),
            pl.BlockSpec(b1_p.shape, lambda g: (0, 0)),
            pl.BlockSpec(w2_p.shape, lambda g: (0, 0)),
            pl.BlockSpec(b2_p.shape, lambda g: (0, 0)),
        ],
        out_specs=pl.BlockSpec((tg, cw), lambda g: (g, 0)),
    )

    pooled = pl.pallas_call(
        kernel,
        out_shape=jax.ShapeDtypeStruct((n_packs_pad, cw), jnp.float32),
        grid_spec=grid_spec,
        compiler_params=pltpu.CompilerParams(
            dimension_semantics=("parallel",),
            vmem_limit_bytes=48 * 1024 * 1024),
        cost_estimate=pl.CostEstimate(
            flops=flops, transcendentals=0, bytes_accessed=bytes_accessed),
    )(x4, wt_p, bt_p, w1_p, b1_p, w2_p, b2_p)

    # Un-interleave the lane packing on the tiny pooled result:
    #   pooled[q, j*C:(j+1)*C] holds group g = j*n_packs_pad + q.
    out = (pooled.reshape(n_packs_pad, pack, c_out)
           .transpose(1, 0, 2)
           .reshape(b_tot, c_out)[:B])
    # [B, C] -> [b, n, C] -> [b, C, n]
    return out.reshape(b, n, c_out).transpose(0, 2, 1)


def _reference_forward(x, params):
    """Pure-JAX reference of the same math (eval-mode BN folded, bf16 matmuls
    with f32 accumulation — matching the kernel's numerics)."""
    b, n, s, d = x.shape
    xb = x.reshape(b * n, s, d).astype(jnp.bfloat16)
    wt = params["wt"].astype(jnp.bfloat16)
    w1 = params["w1"].astype(jnp.bfloat16)
    w2 = params["w2"].astype(jnp.bfloat16)
    h = jnp.maximum(
        jnp.einsum("bsd,dc->bsc", xb, wt, preferred_element_type=jnp.float32)
        + params["bt"][None, None, :], 0.0)
    h1 = jnp.maximum(
        jnp.einsum("bsc,ch->bsh", h.astype(jnp.bfloat16), w1,
                   preferred_element_type=jnp.float32)
        + params["b1"][None, None, :], 0.0)
    h2 = jnp.einsum("bsh,hc->bsc", h1.astype(jnp.bfloat16), w2,
                    preferred_element_type=jnp.float32) + params["b2"][None, None, :]
    y = jnp.maximum(h2 + h, 0.0)
    pooled = jnp.max(y, axis=1)                    # [B, C]
    return pooled.reshape(b, n, -1).transpose(0, 2, 1)


def make_params(key, in_channels, out_channels, res_expansion=1.0):
    hidden = int(out_channels * res_expansion)
    ks = jax.random.split(key, 9)
    scale = 0.1

    def bn_params(k, c):
        kk = jax.random.split(k, 4)
        gamma = 1.0 + 0.1 * jax.random.normal(kk[0], (c,), jnp.float32)
        beta = 0.1 * jax.random.normal(kk[1], (c,), jnp.float32)
        mean = 0.1 * jax.random.normal(kk[2], (c,), jnp.float32)
        var = jnp.abs(1.0 + 0.1 * jax.random.normal(kk[3], (c,), jnp.float32))
        return gamma, beta, mean, var

    # transfer: Conv1d(in_channels -> out_channels, k=1) + BN
    wt = scale * jax.random.normal(ks[0], (in_channels, out_channels), jnp.float32)
    bt = scale * jax.random.normal(ks[1], (out_channels,), jnp.float32)
    wt, bt = _fold_bn(wt, bt, *bn_params(ks[2], out_channels))

    # res block net1: Conv1d(out_channels -> hidden, k=1) + BN
    w1 = scale * jax.random.normal(ks[3], (out_channels, hidden), jnp.float32)
    b1 = scale * jax.random.normal(ks[4], (hidden,), jnp.float32)
    w1, b1 = _fold_bn(w1, b1, *bn_params(ks[5], hidden))

    # res block net2: Conv1d(hidden -> out_channels, k=1) + BN
    w2 = scale * jax.random.normal(ks[6], (hidden, out_channels), jnp.float32)
    b2 = scale * jax.random.normal(ks[7], (out_channels,), jnp.float32)
    w2, b2 = _fold_bn(w2, b2, *bn_params(ks[8], out_channels))

    return {"wt": wt, "bt": bt, "w1": w1, "b1": b1, "w2": w2, "b2": b2}


if __name__ == "__main__":
    # Module config (defaults): blocks=1, groups=1, res_expansion=1, use_xyz=True
    channels = 4
    use_xyz = True
    in_channels = 3 + 2 * channels if use_xyz else 2 * channels   # = 11
    out_channels = 32

    b, n, s, d = 2, 8, 16, in_channels
    key = jax.random.PRNGKey(0)
    kx, kp = jax.random.split(key)
    x = jax.random.normal(kx, (b, n, s, d), jnp.float32)
    params = make_params(kp, in_channels, out_channels, res_expansion=1.0)

    out = pre_extraction_forward(x, params)
    out = jax.block_until_ready(out)

    ref = _reference_forward(x, params)
    assert out.shape == (b, out_channels, n), out.shape
    assert jnp.allclose(out, ref, atol=2e-3, rtol=2e-3), "mismatch vs reference"

    print("KERNEL_OK")
</pallas_src>

<mosaic_0001>
module attributes {stable_mosaic.version = 11 : i64} {
  func.func @_pre_extraction_kernel(%arg0: i32, %arg1: memref<4x64x11xbf16, #tpu.memory_space<vmem>>, %arg2: memref<4x11x128xbf16, #tpu.memory_space<vmem>>, %arg3: memref<1x128xf32, #tpu.memory_space<vmem>>, %arg4: memref<128x128xbf16, #tpu.memory_space<vmem>>, %arg5: memref<1x128xf32, #tpu.memory_space<vmem>>, %arg6: memref<128x128xbf16, #tpu.memory_space<vmem>>, %arg7: memref<1x128xf32, #tpu.memory_space<vmem>>, %arg8: memref<4x128xf32, #tpu.memory_space<vmem>>) attributes {dimension_semantics = [#tpu.dimension_semantics<parallel>], iteration_bounds = array<i64: 1>, scalar_prefetch = 0 : i64, scratch_operands = 0 : i64, tpu.core_type = #tpu.core_type<tc>, window_params = [{transform_indices = @transform_0, window_bounds = array<i64: 4, 64, 11>}, {pipeline_mode = #tpu.pipeline_mode<synchronous>, transform_indices = @transform_1, window_bounds = array<i64: 4, 11, 128>}, {pipeline_mode = #tpu.pipeline_mode<synchronous>, transform_indices = @transform_2, window_bounds = array<i64: 1, 128>}, {pipeline_mode = #tpu.pipeline_mode<synchronous>, transform_indices = @transform_3, window_bounds = array<i64: 128, 128>}, {pipeline_mode = #tpu.pipeline_mode<synchronous>, transform_indices = @transform_4, window_bounds = array<i64: 1, 128>}, {pipeline_mode = #tpu.pipeline_mode<synchronous>, transform_indices = @transform_5, window_bounds = array<i64: 128, 128>}, {pipeline_mode = #tpu.pipeline_mode<synchronous>, transform_indices = @transform_6, window_bounds = array<i64: 1, 128>}, {transform_indices = @transform_7, window_bounds = array<i64: 4, 128>}]} {
    %c0 = arith.constant 0 : index
    %c0_0 = arith.constant 0 : index
    %c0_1 = arith.constant 0 : index
    %0 = vector.load %arg1[%c0, %c0_0, %c0_1] : memref<4x64x11xbf16, #tpu.memory_space<vmem>>, vector<1x64x11xbf16>
    %1 = vector.shape_cast %0 : vector<1x64x11xbf16> to vector<64x11xbf16>
    %c0_2 = arith.constant 0 : index
    %c0_3 = arith.constant 0 : index
    %c0_4 = arith.constant 0 : index
    %2 = vector.load %arg2[%c0_2, %c0_3, %c0_4] : memref<4x11x128xbf16, #tpu.memory_space<vmem>>, vector<1x11x128xbf16>
    %3 = vector.shape_cast %2 : vector<1x11x128xbf16> to vector<11x128xbf16>
    %cst = arith.constant dense<0.000000e+00> : vector<64x128xf32>
    %4 = tpu.matmul %1, %3, %cst {dimension_numbers = #tpu.dot_dimension_numbers<[1], [0], [0], [1], [0, 0, 1, 1], [], []>} : vector<64x11xbf16>, vector<11x128xbf16>, vector<64x128xf32> -> vector<64x128xf32>
    %c1 = arith.constant 1 : index
    %c0_5 = arith.constant 0 : index
    %c0_6 = arith.constant 0 : index
    %5 = vector.load %arg1[%c1, %c0_5, %c0_6] : memref<4x64x11xbf16, #tpu.memory_space<vmem>>, vector<1x64x11xbf16>
    %6 = vector.shape_cast %5 : vector<1x64x11xbf16> to vector<64x11xbf16>
    %c1_7 = arith.constant 1 : index
    %c0_8 = arith.constant 0 : index
    %c0_9 = arith.constant 0 : index
    %7 = vector.load %arg2[%c1_7, %c0_8, %c0_9] : memref<4x11x128xbf16, #tpu.memory_space<vmem>>, vector<1x11x128xbf16>
    %8 = vector.shape_cast %7 : vector<1x11x128xbf16> to vector<11x128xbf16>
    %cst_10 = arith.constant dense<0.000000e+00> : vector<64x128xf32>
    %9 = tpu.matmul %6, %8, %cst_10 {dimension_numbers = #tpu.dot_dimension_numbers<[1], [0], [0], [1], [0, 0, 1, 1], [], []>} : vector<64x11xbf16>, vector<11x128xbf16>, vector<64x128xf32> -> vector<64x128xf32>
    %10 = arith.addf %4, %9 : vector<64x128xf32>
    %c2 = arith.constant 2 : index
    %c0_11 = arith.constant 0 : index
    %c0_12 = arith.constant 0 : index
    %11 = vector.load %arg1[%c2, %c0_11, %c0_12] : memref<4x64x11xbf16, #tpu.memory_space<vmem>>, vector<1x64x11xbf16>
    %12 = vector.shape_cast %11 : vector<1x64x11xbf16> to vector<64x11xbf16>
    %c2_13 = arith.constant 2 : index
    %c0_14 = arith.constant 0 : index
    %c0_15 = arith.constant 0 : index
    %13 = vector.load %arg2[%c2_13, %c0_14, %c0_15] : memref<4x11x128xbf16, #tpu.memory_space<vmem>>, vector<1x11x128xbf16>
    %14 = vector.shape_cast %13 : vector<1x11x128xbf16> to vector<11x128xbf16>
    %cst_16 = arith.constant dense<0.000000e+00> : vector<64x128xf32>
    %15 = tpu.matmul %12, %14, %cst_16 {dimension_numbers = #tpu.dot_dimension_numbers<[1], [0], [0], [1], [0, 0, 1, 1], [], []>} : vector<64x11xbf16>, vector<11x128xbf16>, vector<64x128xf32> -> vector<64x128xf32>
    %16 = arith.addf %10, %15 : vector<64x128xf32>
    %c3 = arith.constant 3 : index
    %c0_17 = arith.constant 0 : index
    %c0_18 = arith.constant 0 : index
    %17 = vector.load %arg1[%c3, %c0_17, %c0_18] : memref<4x64x11xbf16, #tpu.memory_space<vmem>>, vector<1x64x11xbf16>
    %18 = vector.shape_cast %17 : vector<1x64x11xbf16> to vector<64x11xbf16>
    %c3_19 = arith.constant 3 : index
    %c0_20 = arith.constant 0 : index
    %c0_21 = arith.constant 0 : index
    %19 = vector.load %arg2[%c3_19, %c0_20, %c0_21] : memref<4x11x128xbf16, #tpu.memory_space<vmem>>, vector<1x11x128xbf16>
    %20 = vector.shape_cast %19 : vector<1x11x128xbf16> to vector<11x128xbf16>
    %cst_22 = arith.constant dense<0.000000e+00> : vector<64x128xf32>
    %21 = tpu.matmul %18, %20, %cst_22 {dimension_numbers = #tpu.dot_dimension_numbers<[1], [0], [0], [1], [0, 0, 1, 1], [], []>} : vector<64x11xbf16>, vector<11x128xbf16>, vector<64x128xf32> -> vector<64x128xf32>
    %22 = arith.addf %16, %21 : vector<64x128xf32>
    %c0_23 = arith.constant 0 : index
    %c0_24 = arith.constant 0 : index
    %23 = vector.load %arg3[%c0_23, %c0_24] : memref<1x128xf32, #tpu.memory_space<vmem>>, vector<1x128xf32>
    %24 = vector.broadcast %23 : vector<1x128xf32> to vector<64x128xf32>
    %25 = arith.addf %22, %24 : vector<64x128xf32>
    %cst_25 = arith.constant 0.000000e+00 : f32
    %26 = vector.broadcast %cst_25 : f32 to vector<64x128xf32>
    %27 = arith.maximumf %25, %26 : vector<64x128xf32>
    %28 = arith.truncf %27 : vector<64x128xf32> to vector<64x128xbf16>
    %c0_26 = arith.constant 0 : index
    %c0_27 = arith.constant 0 : index
    %29 = vector.load %arg4[%c0_26, %c0_27] : memref<128x128xbf16, #tpu.memory_space<vmem>>, vector<128x128xbf16>
    %cst_28 = arith.constant dense<0.000000e+00> : vector<64x128xf32>
    %30 = tpu.matmul %28, %29, %cst_28 {dimension_numbers = #tpu.dot_dimension_numbers<[1], [0], [0], [1], [0, 0, 1, 1], [], []>} : vector<64x128xbf16>, vector<128x128xbf16>, vector<64x128xf32> -> vector<64x128xf32>
    %c0_29 = arith.constant 0 : index
    %c0_30 = arith.constant 0 : index
    %31 = vector.load %arg5[%c0_29, %c0_30] : memref<1x128xf32, #tpu.memory_space<vmem>>, vector<1x128xf32>
    %32 = vector.broadcast %31 : vector<1x128xf32> to vector<64x128xf32>
    %33 = arith.addf %30, %32 : vector<64x128xf32>
    %cst_31 = arith.constant 0.000000e+00 : f32
    %34 = vector.broadcast %cst_31 : f32 to vector<64x128xf32>
    %35 = arith.maximumf %33, %34 : vector<64x128xf32>
    %36 = arith.truncf %35 : vector<64x128xf32> to vector<64x128xbf16>
    %c0_32 = arith.constant 0 : index
    %c0_33 = arith.constant 0 : index
    %37 = vector.load %arg6[%c0_32, %c0_33] : memref<128x128xbf16, #tpu.memory_space<vmem>>, vector<128x128xbf16>
    %cst_34 = arith.constant dense<0.000000e+00> : vector<64x128xf32>
    %38 = tpu.matmul %36, %37, %cst_34 {dimension_numbers = #tpu.dot_dimension_numbers<[1], [0], [0], [1], [0, 0, 1, 1], [], []>} : vector<64x128xbf16>, vector<128x128xbf16>, vector<64x128xf32> -> vector<64x128xf32>
    %c0_35 = arith.constant 0 : index
    %c0_36 = arith.constant 0 : index
    %39 = vector.load %arg7[%c0_35, %c0_36] : memref<1x128xf32, #tpu.memory_space<vmem>>, vector<1x128xf32>
    %40 = vector.broadcast %39 : vector<1x128xf32> to vector<64x128xf32>
    %41 = arith.addf %38, %40 : vector<64x128xf32>
    %42 = arith.addf %41, %27 : vector<64x128xf32>
    %cst_37 = arith.constant 0.000000e+00 : f32
    %43 = vector.broadcast %cst_37 : f32 to vector<64x128xf32>
    %44 = arith.maximumf %42, %43 : vector<64x128xf32>
    %45 = vector.shape_cast %44 : vector<64x128xf32> to vector<4x16x128xf32>
    %cst_38 = arith.constant dense<0xFF800000> : vector<4x128xf32>
    %46 = vector.multi_reduction <maximumf>, %45, %cst_38 [1] : vector<4x16x128xf32> to vector<4x128xf32>
    %c0_39 = arith.constant 0 : index
    %c0_40 = arith.constant 0 : index
    %47 = vector.load %arg8[%c0_39, %c0_40] : memref<4x128xf32, #tpu.memory_space<vmem>>, vector<4x128xf32>
    tpu.vector_store %arg8[%c0_39, %c0_40], %46 {strides = array<i32>} : memref<4x128xf32, #tpu.memory_space<vmem>>, vector<4x128xf32>,
    return
  }
  func.func @transform_0(%arg0: i32) -> (i32, i32, i32) {
    %c0_i32 = arith.constant 0 : i32
    %c0_i32_0 = arith.constant 0 : i32
    %c0_i32_1 = arith.constant 0 : i32
    return %c0_i32, %arg0, %c0_i32_0 : i32, i32, i32
  }
  func.func @transform_1(%arg0: i32) -> (i32, i32, i32) {
    %c0_i32 = arith.constant 0 : i32
    %c0_i32_0 = arith.constant 0 : i32
    %c0_i32_1 = arith.constant 0 : i32
    %c0_i32_2 = arith.constant 0 : i32
    return %c0_i32, %c0_i32_0, %c0_i32_1 : i32, i32, i32
  }
  func.func @transform_2(%arg0: i32) -> (i32, i32) {
    %c0_i32 = arith.constant 0 : i32
    %c0_i32_0 = arith.constant 0 : i32
    %c0_i32_1 = arith.constant 0 : i32
    return %c0_i32, %c0_i32_0 : i32, i32
  }
  func.func @transform_3(%arg0: i32) -> (i32, i32) {
    %c0_i32 = arith.constant 0 : i32
    %c0_i32_0 = arith.constant 0 : i32
    %c0_i32_1 = arith.constant 0 : i32
    return %c0_i32, %c0_i32_0 : i32, i32
  }
  func.func @transform_4(%arg0: i32) -> (i32, i32) {
    %c0_i32 = arith.constant 0 : i32
    %c0_i32_0 = arith.constant 0 : i32
    %c0_i32_1 = arith.constant 0 : i32
    return %c0_i32, %c0_i32_0 : i32, i32
  }
  func.func @transform_5(%arg0: i32) -> (i32, i32) {
    %c0_i32 = arith.constant 0 : i32
    %c0_i32_0 = arith.constant 0 : i32
    %c0_i32_1 = arith.constant 0 : i32
    return %c0_i32, %c0_i32_0 : i32, i32
  }
  func.func @transform_6(%arg0: i32) -> (i32, i32) {
    %c0_i32 = arith.constant 0 : i32
    %c0_i32_0 = arith.constant 0 : i32
    %c0_i32_1 = arith.constant 0 : i32
    return %c0_i32, %c0_i32_0 : i32, i32
  }
  func.func @transform_7(%arg0: i32) -> (i32, i32) {
    %c0_i32 = arith.constant 0 : i32
    %c0_i32_0 = arith.constant 0 : i32
    return %arg0, %c0_i32 : i32, i32
  }
}

</mosaic_0001>

<bundles_post_ra>
// kernel: tpu_custom_call.1
= control target key start
LH: loop header
LB: loop body
LE: loop exit
PB: predicated region body
PF: predicated region fallthrough
CT: control target
= control target key end

     0   :  { %vm88_vm0 = vcmask 1044480   ;;  %vm89_vm1 = vcmask 1045504   ;;  %v1199_v2 = vmov 65535   ;;  %vm75_vm2 = vcmask 89088   ;;  %s1442_s0 = inlined_call_operand.vmem [shape: bf16[4,64,11], index: 0, kind: input, shape index: {}]   ;;  %s1443_s1 = inlined_call_operand.vmem [shape: bf16[4,11,128], index: 1, kind: input, shape index: {}]   ;;  %s1444_s2 = inlined_call_operand.vmem [shape: f32[1,128], index: 2, kind: input, shape index: {}]   ;;  %s1445_s3 = inlined_call_operand.vmem [shape: bf16[128,128], index: 3, kind: input, shape index: {}]   ;;  %s1446_s4 = inlined_call_operand.vmem [shape: f32[1,128], index: 4, kind: input, shape index: {}]   ;;  %s1447_s5 = inlined_call_operand.vmem [shape: bf16[128,128], index: 5, kind: input, shape index: {}]   ;;  %s1448_s6 = inlined_call_operand.vmem [shape: f32[1,128], index: 6, kind: input, shape index: {}]   ;;  %s1449_s7 = inlined_call_operand.hbm [shape: f32[4,128], index: 7, kind: output, shape index: {}]  }
   0x1   :  { %v1139_v0 = vld [vmem:[%s1443_s1 + $0x8] sm:$0x3f]   ;;  %v1140_v1 = vld [vmem:[%s1442_s0 + $0x20] sm:$0xff]   ;;  %v90_v3 = vsel %vm88_vm0, 4294967295, %v1199_v2  ;;  %v1143_v9 = vld [vmem:[%s1442_s0 + $0x30] sm:$0xff]  }
   0x2   :  { %v91_v4 = vsel %vm89_vm1, %v90_v3, 0  ;;  %1027 = vmatprep.mubr.msk.bf16.mxu0 %vm75_vm2, %v1140_v1  ;;  %v1142_v6 = vld [vmem:[%s1443_s1] sm:$0x3f]   ;;  %v1141_v7 = vld [vmem:[%s1442_s0 + $0x28] sm:$0xff]   ;;  %v1147_v10 = vld [vmem:[%s1443_s1 + $0x10] sm:$0x3f]  }
   0x3   :  { %v93_v5 = vand.u32 %v1139_v0, %v91_v4  ;;  %v198_v8 = vand.u32 %v1142_v6, %v91_v4  ;;  %v315_v11 = vand.u32 %v1147_v10, %v91_v4  ;;  %v1144_v12 = vld [vmem:[%s1442_s0 + $0x38] sm:$0xff]   ;;  %v1145_v13 = vld [vmem:[%s1442_s0] sm:$0xff]   ;;  %v1146_v14 = vld [vmem:[%s1442_s0 + $0x8] sm:$0xff]  }
   0x4   :  { %v1152_v15 = vld [vmem:[%s1443_s1 + $0x18] sm:$0x3f]   ;;  %v1159_v16 = vld [vmem:[%s1445_s3] sm:$0xff]   ;;  %v1160_v17 = vld [vmem:[%s1445_s3 + $0x8] sm:$0xff]  }
   0x5   :  { %1025 = vmatprep.subr.bf16.mxu0 %v93_v5  ;;  %v1148_v18 = vld [vmem:[%s1442_s0 + $0x10] sm:$0xff]   ;;  %1065 = vmatprep.subr.bf16.mxu1 %v1159_v16  ;;  %v440_v19 = vand.u32 %v1152_v15, %v91_v4  ;;  %v1162_v21 = vld [vmem:[%s1445_s3 + $0x18] sm:$0xff]   ;;  %v1150_v23 = vld [vmem:[%s1442_s0 + $0x40] sm:$0xff]  }
   0x6   :  { %1026 = vmatpush3.bf16.msra.mxu0 %v93_v5  ;;  %1066 = vmatpush3.bf16.msra.mxu1 %v1159_v16  ;;  %v1161_v20 = vld [vmem:[%s1445_s3 + $0x10] sm:$0xff]   ;;  %v1149_v22 = vld [vmem:[%s1442_s0 + $0x18] sm:$0xff]   ;;  %v1163_v24 = vld [vmem:[%s1445_s3 + $0x20] sm:$0xff]  }
   0x7   :  { %1035 = vmatprep.subr.bf16.mxu0 %v198_v8  ;;  %1067 = vmatprep.subr.bf16.mxu1 %v1160_v17 }
   0x9   :  { %1028 = vmatmul.mubr.msk.bf16.vlgmr.msra.gmra.mrb[0].mxu0 %vm75_vm2, %v1141_v7 }
   0xa   :  { %1036 = vmatpush3.bf16.msra.mxu0 %v198_v8  ;;  %1031 = vmatprep.mubr.msk.bf16.mxu0 %vm75_vm2, %v1143_v9 }
   0xb   :  { %1045 = vmatprep.subr.bf16.mxu0 %v315_v11  ;;  %1068 = vmatpush3.bf16.msra.mxu1 %v1160_v17 }
   0xc   :  { %1069 = vmatprep.subr.bf16.mxu1 %v1161_v20 }
   0xf   :  { %1070 = vmatpush3.bf16.msra.mxu1 %v1161_v20 }
  0x10   :  { %1071 = vmatprep.subr.bf16.mxu1 %v1162_v21 }
  0x11   :  { %1032 = vmatmul.mubr.msk.bf16.gmra.mrb[4].mxu0 %vm75_vm2, %v1144_v12 }
  0x12   :  { %1037 = vmatprep.mubr.msk.bf16.mxu0 %vm75_vm2, %v1145_v13 }
  0x19   :  { %1038 = vmatmul.mubr.msk.bf16.vlgmr.msra.gmra.mrb[0].mxu0 %vm75_vm2, %v1146_v14 }
  0x1a   :  { %1046 = vmatpush3.bf16.msra.mxu0 %v315_v11  ;;  %1041 = vmatprep.mubr.msk.bf16.mxu0 %vm75_vm2, %v1148_v18 }
  0x1b   :  { %1055 = vmatprep.subr.bf16.mxu0 %v440_v19 }
  0x1c   :  { %12 = vsyncpa [#allocation3], 0  ;;  %1072 = vmatpush3.bf16.msra.mxu1 %v1162_v21  ;;  %v1164_v25 = vld [vmem:[%s1445_s3 + $0x28] sm:$0xff]   ;;  %v1153_v27 = vld [vmem:[%s1442_s0 + $0x50] sm:$0xff]   ;;  %vm874_vm3 = vcmask 1041409   ;;  %vm876_vm4 = vcmask 1042434  }
  0x1d   :  { %1073 = vmatprep.subr.bf16.mxu1 %v1163_v24  ;;  %v1151_v26 = vld [vmem:[%s1442_s0 + $0x48] sm:$0xff]   ;;  %v1154_v28 = vld [vmem:[%s1442_s0 + $0x58] sm:$0xff]   ;;  %v1155_v29 = vld [vmem:[%s1442_s0 + $0x60] sm:$0xff]   ;;  %vm878_vm5 = vcmask 1043459  }
  0x1e   :  { %v1156_v30 = vld [vmem:[%s1442_s0 + $0x68] sm:$0xff]   ;;  %v1157_v31 = vld [vmem:[%s1442_s0 + $0x70] sm:$0xff]   ;;  %v1158_v32 = vld [vmem:[%s1442_s0 + $0x78] sm:$0xff]  }
  0x1f   :  { %v1165_v33 = vld [vmem:[%s1445_s3 + $0x30] sm:$0xff]   ;;  %v1166_v34 = vld [vmem:[%s1445_s3 + $0x38] sm:$0xff]   ;;  %v1167_v35 = vld [vmem:[%s1447_s5] sm:$0xff]  }
  0x20   :  { %1074 = vmatpush3.bf16.msra.mxu1 %v1163_v24  ;;  %v962_v36 = vld [vmem:[%s1444_s2] ss:$0 sm:$0xff]  ;;  %v1168_v53 = vld [vmem:[%s1447_s5 + $0x8] sm:$0xff]   ;;  %v1169_v61 = vld [vmem:[%s1447_s5 + $0x10] sm:$0xff]  }
  0x21   :  { %1042 = vmatmul.mubr.msk.bf16.gmra.mrb[4].mxu0 %vm75_vm2, %v1149_v22  ;;  %1075 = vmatprep.subr.bf16.mxu1 %v1164_v25  ;;  %v1170_v3 = vld [vmem:[%s1447_s5 + $0x18] sm:$0xff]   ;;  %v1171_v4 = vld [vmem:[%s1447_s5 + $0x20] sm:$0xff]   ;;  %v1172_v5 = vld [vmem:[%s1447_s5 + $0x28] sm:$0xff]  }
  0x22   :  { %1047 = vmatprep.mubr.msk.bf16.mxu0 %vm75_vm2, %v1150_v23  ;;  %v1173_v6 = vld [vmem:[%s1447_s5 + $0x30] sm:$0xff]   ;;  %v1174_v7 = vld [vmem:[%s1447_s5 + $0x38] sm:$0xff]   ;;  %v963_v8 = vld [vmem:[%s1446_s4] ss:$0 sm:$0xff] }
  0x24   :  { %1076 = vmatpush3.bf16.msra.mxu1 %v1164_v25 }
  0x25   :  { %1077 = vmatprep.subr.bf16.mxu1 %v1165_v33 }
  0x28   :  { %1078 = vmatpush3.bf16.msra.mxu1 %v1165_v33 }
  0x29   :  { %1048 = vmatmul.mubr.msk.bf16.vlgmr.msra.gmra.mrb[0].mxu0 %vm75_vm2, %v1151_v26  ;;  %1079 = vmatprep.subr.bf16.mxu1 %v1166_v34 }
  0x2a   :  { %1056 = vmatpush3.bf16.msra.mxu0 %v440_v19  ;;  %1051 = vmatprep.mubr.msk.bf16.mxu0 %vm75_vm2, %v1153_v27 }
  0x2c   :  { %1080 = vmatpush3.bf16.msra.mxu1 %v1166_v34 }
  0x2d   :  { %1089 = vmatprep.subr.bf16.mxu1 %v1167_v35 }
  0x31   :  { %1052 = vmatmul.mubr.msk.bf16.gmra.mrb[4].mxu0 %vm75_vm2, %v1154_v28 }
  0x32   :  { %1057 = vmatprep.mubr.msk.bf16.mxu0 %vm75_vm2, %v1155_v29 }
  0x39   :  { %1058 = vmatmul.mubr.msk.bf16.vlgmr.msra.gmra.mrb[0].mxu0 %vm75_vm2, %v1156_v30 }
  0x3a   :  { %1061 = vmatprep.mubr.msk.bf16.mxu0 %vm75_vm2, %v1157_v31 }
  0x41   :  { %1062 = vmatmul.mubr.msk.bf16.gmra.mrb[4].mxu0 %vm75_vm2, %v1158_v32 }
 0x10c   :  { %v1059_v37 = vpop.f32.mrb[0].mxu0 }
 0x10d   :  { %v476_v38 = vpop.f32.mrb[1].mxu0  ;;  %v1349_v41 = vadd.f32 %v1059_v37, %v962_v36  ;;  %v972_v37 = vld [vmem:[%s1448_s6] ss:$0 sm:$0xff]  ;;  %s1200_s6 = smov [#allocation2]  }
 0x10e   :  { %v1347_v39 = vadd.f32 %v962_v36, %v476_v38  ;;  %v1060_v40 = vpop.f32.mrb[2].mxu0  ;;  %s888_s26 = sshll.u32 %s1200_s6, 4  ;;  %s889_s26 = int_to_ptr.vmem [resolvable:$true] %s888_s26 }
 0x10f   :  { %v1351_v42 = vadd.f32 %v1060_v40, %v962_v36  ;;  %v479_v43 = vpop.f32.mrb[3].mxu0  ;;  %v532_v48 = vmax.f32 %v1349_v41, 0.0  ;;  %s1175_s27 = scalar_lea.vmem %s889_s26, 64  ;;  %p1180_p1 = scmp.lt.s32.totalorder %s889_s26, %s889_s26 }
 0x110   :  { %v1353_v44 = vadd.f32 %v962_v36, %v479_v43  ;;  %v530_v46 = vmax.f32 %v1347_v39, 0.0  ;;  %p1176_p0 = scmp.ne.s32.totalorder %s889_s26, %s1175_s27  ;;  %p1181_p2 = scmp.lt.s32.totalorder %s1175_s27, %s1175_s27 }
 0x111   :  { %v533_v45 = vmax.f32 %v1351_v42, 0.0 }
 0x112   :  { %v531_v47 = vmax.f32 %v1353_v44, 0.0  ;;  %p1182_p3 = por %p1181_p2, %p1180_p1 }
 0x113   :  { %v539_v51 = vpack.c.bf16 %v533_v45, %v532_v48 }
 0x114   :  { %v1063_v49 = vpop.f32.mrb[4].mxu0  ;;  %v538_v50 = vpack.c.bf16 %v531_v47, %v530_v46  ;;  %p1183_p4 = pnand %p1182_p3, %p1176_p0 }
 0x115   :  { %v492_v52 = vpop.f32.mrb[5].mxu0  ;;  %v1372_v56 = vadd.f32 %v1063_v49, %v962_v36 }
 0x116   :  { %v1370_v54 = vadd.f32 %v962_v36, %v492_v52  ;;  %v1064_v55 = vpop.f32.mrb[6].mxu0  ;;  %1081 = vmatprep.mubr.bf16.mxu1 %v538_v50 }
 0x117   :  { %v1374_v57 = vadd.f32 %v1064_v55, %v962_v36  ;;  %v495_v58 = vpop.f32.mrb[7].mxu0  ;;  %1082 = vmatmul.mubr.bf16.vlgmr.msra.gmra.mrb[0].mxu1 %v539_v51  ;;  %v536_v0 = vmax.f32 %v1372_v56, 0.0 }
 0x118   :  { %v1376_v59 = vadd.f32 %v962_v36, %v495_v58  ;;  %1090 = vmatpush3.bf16.msra.mxu1 %v1167_v35  ;;  %v534_v62 = vmax.f32 %v1370_v54, 0.0 }
 0x119   :  { %v537_v60 = vmax.f32 %v1374_v57, 0.0  ;;  %1091 = vmatprep.subr.bf16.mxu1 %v1168_v53 }
 0x11a   :  { %v535_v63 = vmax.f32 %v1376_v59, 0.0 }
 0x11b   :  { %v541_v2 = vpack.c.bf16 %v537_v60, %v536_v0 }
 0x11c   :  { %v540_v1 = vpack.c.bf16 %v535_v63, %v534_v62  ;;  %1092 = vmatpush3.bf16.msra.mxu1 %v1168_v53 }
 0x11d   :  { %1093 = vmatprep.subr.bf16.mxu1 %v1169_v61 }
 0x11e   :  { %1085 = vmatprep.mubr.bf16.mxu1 %v540_v1 }
 0x11f   :  { %1086 = vmatmul.mubr.bf16.gmra.mrb[4].mxu1 %v541_v2 }
 0x120   :  { %1094 = vmatpush3.bf16.msra.mxu1 %v1169_v61 }
 0x121   :  { %1095 = vmatprep.subr.bf16.mxu1 %v1170_v3 }
 0x124   :  { %1096 = vmatpush3.bf16.msra.mxu1 %v1170_v3 }
 0x125   :  { %1097 = vmatprep.subr.bf16.mxu1 %v1171_v4 }
 0x128   :  { %1098 = vmatpush3.bf16.msra.mxu1 %v1171_v4 }
 0x129   :  { %1099 = vmatprep.subr.bf16.mxu1 %v1172_v5 }
 0x12c   :  { %1100 = vmatpush3.bf16.msra.mxu1 %v1172_v5 }
 0x12d   :  { %1101 = vmatprep.subr.bf16.mxu1 %v1173_v6 }
 0x130   :  { %1102 = vmatpush3.bf16.msra.mxu1 %v1173_v6 }
 0x131   :  { %1103 = vmatprep.subr.bf16.mxu1 %v1174_v7 }
 0x134   :  { %1104 = vmatpush3.bf16.msra.mxu1 %v1174_v7 }
 0x1ea   :  { %v1083_v9 = vpop.f32.mrb[0].mxu1 }
 0x1eb   :  { %v656_v10 = vadd.f32 %v1083_v9, %v963_v8  ;;  %v647_v11 = vpop.f32.mrb[1].mxu1 }
 0x1ec   :  { %v648_v12 = vadd.f32 %v963_v8, %v647_v11  ;;  %v1084_v13 = vpop.f32.mrb[2].mxu1 }
 0x1ed   :  { %v659_v14 = vadd.f32 %v1084_v13, %v963_v8  ;;  %v650_v15 = vpop.f32.mrb[3].mxu1  ;;  %v680_v17 = vmax.f32 %v656_v10, 0.0 }
 0x1ee   :  { %v651_v16 = vadd.f32 %v963_v8, %v650_v15  ;;  %v678_v19 = vmax.f32 %v648_v12, 0.0 }
 0x1ef   :  { %v681_v18 = vmax.f32 %v659_v14, 0.0 }
 0x1f0   :  { %v679_v20 = vmax.f32 %v651_v16, 0.0 }
 0x1f1   :  { %v687_v21 = vpack.c.bf16 %v681_v18, %v680_v17 }
 0x1f2   :  { %v686_v22 = vpack.c.bf16 %v679_v20, %v678_v19  ;;  %v1087_v23 = vpop.f32.mrb[4].mxu1 }
 0x1f3   :  { %v672_v24 = vadd.f32 %v1087_v23, %v963_v8  ;;  %v663_v25 = vpop.f32.mrb[5].mxu1 }
 0x1f4   :  { %v664_v26 = vadd.f32 %v963_v8, %v663_v25  ;;  %v1088_v27 = vpop.f32.mrb[6].mxu1  ;;  %1105 = vmatprep.mubr.bf16.mxu1 %v686_v22 }
 0x1f5   :  { %v675_v28 = vadd.f32 %v1088_v27, %v963_v8  ;;  %v666_v29 = vpop.f32.mrb[7].mxu1  ;;  %1106 = vmatmul.mubr.bf16.vlgmr.msra.gmra.mrb[8].mxu1 %v687_v21  ;;  %v684_v31 = vmax.f32 %v672_v24, 0.0 }
 0x1f6   :  { %v667_v30 = vadd.f32 %v963_v8, %v666_v29  ;;  %v682_v33 = vmax.f32 %v664_v26, 0.0 }
 0x1f7   :  { %v685_v32 = vmax.f32 %v675_v28, 0.0 }
 0x1f8   :  { %v683_v34 = vmax.f32 %v667_v30, 0.0 }
 0x1f9   :  { %v689_v35 = vpack.c.bf16 %v685_v32, %v684_v31 }
 0x1fa   :  { %v688_v36 = vpack.c.bf16 %v683_v34, %v682_v33 }
 0x1fc   :  { %1109 = vmatprep.mubr.bf16.mxu1 %v688_v36 }
 0x1fd   :  { %1110 = vmatmul.mubr.bf16.gmra.mrb[12].mxu1 %v689_v35 }
 0x2c8   :  { %v1107_v38 = vpop.f32.mrb[8].mxu1 }
 0x2c9   :  { %v804_v40 = vadd.f32 %v1107_v38, %v972_v37  ;;  %v795_v43 = vpop.f32.mrb[9].mxu1 }
 0x2ca   :  { %v796_v49 = vadd.f32 %v972_v37, %v795_v43  ;;  %v1108_v50 = vpop.f32.mrb[10].mxu1 }
 0x2cb   :  { %v828_v51 = vadd.f32 %v804_v40, %v532_v48  ;;  %v807_v52 = vadd.f32 %v1108_v50, %v972_v37  ;;  %v798_v53 = vpop.f32.mrb[11].mxu1 }
 0x2cc   :  { %v826_v55 = vadd.f32 %v796_v49, %v530_v46  ;;  %v799_v58 = vadd.f32 %v972_v37, %v798_v53 }
 0x2cd   :  { %v829_v61 = vadd.f32 %v807_v52, %v533_v45  ;;  %v836_v2 = vmax.f32 %v828_v51, 0.0 }
 0x2ce   :  { %v827_v1 = vadd.f32 %v799_v58, %v531_v47  ;;  %v834_v4 = vmax.f32 %v826_v55, 0.0 }
 0x2cf   :  { %v837_v3 = vmax.f32 %v829_v61, 0.0 }
 0x2d0   :  { %v835_v5 = vmax.f32 %v827_v1, 0.0  ;;  %v1111_v6 = vpop.f32.mrb[12].mxu1 }
 0x2d1   :  { %v849_v7 = vmax.f32 %v836_v2, %v837_v3  ;;  %v820_v41 = vadd.f32 %v1111_v6, %v972_v37  ;;  %v811_v48 = vpop.f32.mrb[13].mxu1 }
 0x2d2   :  { %v842_v8 = vmax.f32 %v834_v4, %v835_v5  ;;  %v812_v9 = vadd.f32 %v972_v37, %v811_v48  ;;  %v1112_v10 = vpop.f32.mrb[14].mxu1 }
 0x2d3   :  { %v850_v39 = vrot.slane %v849_v7, 4  ;;  %v832_v46 = vadd.f32 %v820_v41, %v536_v0  ;;  %v823_v42 = vadd.f32 %v1112_v10, %v972_v37  ;;  %v814_v45 = vpop.f32.mrb[15].mxu1 }
 0x2d4   :  { %v843_v11 = vrot.slane %v842_v8, 4  ;;  %v830_v44 = vadd.f32 %v812_v9, %v534_v62  ;;  %v815_v47 = vadd.f32 %v972_v37, %v814_v45 }
 0x2d5   :  { %v851_v12 = vmax.f32 %v849_v7, %v850_v39  ;;  %v833_v13 = vadd.f32 %v823_v42, %v537_v60  ;;  %v840_v17 = vmax.f32 %v832_v46, 0.0 }
 0x2d6   :  { %v844_v14 = vmax.f32 %v842_v8, %v843_v11  ;;  %v831_v15 = vadd.f32 %v815_v47, %v535_v63  ;;  %v838_v0 = vmax.f32 %v830_v44, 0.0 }
 0x2d7   :  { %v852_v16 = vrot.slane %v851_v12, 2  ;;  %v841_v18 = vmax.f32 %v833_v13, 0.0 }
 0x2d8   :  { %v845_v56 = vrot.slane %v844_v14, 2  ;;  %v839_v19 = vmax.f32 %v831_v15, 0.0 }
 0x2d9   :  { %v853_v20 = vmax.f32 %v851_v12, %v852_v16  ;;  %v863_v21 = vmax.f32 %v840_v17, %v841_v18 }
 0x2da   :  { %v846_v22 = vmax.f32 %v844_v14, %v845_v56  ;;  %v856_v54 = vmax.f32 %v838_v0, %v839_v19 }
 0x2db   :  { %v854_v62 = vrot.slane %v853_v20, 1  ;;  %v864_v23 = vrot.slane %v863_v21, 4 }
 0x2dc   :  { %v847_v24 = vrot.slane %v846_v22, 1  ;;  %v857_v25 = vrot.slane %v856_v54, 4 }
 0x2dd   :  { %v865_v57 = vmax.f32 %v863_v21, %v864_v23  ;;  %v855_v60 = vmax.f32 %v853_v20, %v854_v62 }
 0x2de   :  { %v858_v26 = vmax.f32 %v856_v54, %v857_v25  ;;  %v848_v59 = vmax.f32 %v846_v22, %v847_v24 }
 0x2df   :  { %v866_v63 = vrot.slane %v865_v57, 2 }
 0x2e0   :  { %v859_v27 = vrot.slane %v858_v26, 2  ;;  %v875_v28 = vsel %vm874_vm3, %v855_v60, %v848_v59 }
 0x2e1   :  { %v867_v29 = vmax.f32 %v865_v57, %v866_v63 }
 0x2e2   :  { %v860_v30 = vmax.f32 %v858_v26, %v859_v27 }
 0x2e3   :  { %v868_v31 = vrot.slane %v867_v29, 1 }
 0x2e4   :  { %v861_v32 = vrot.slane %v860_v30, 1 }
 0x2e5   :  { %v869_v34 = vmax.f32 %v867_v29, %v868_v31 }
 0x2e6   :  { %v862_v33 = vmax.f32 %v860_v30, %v861_v32 }
 0x2e8   :  { %v877_v35 = vsel %vm876_vm4, %v862_v33, %v875_v28 }
 0x2e9   :  { %v879_v36 = vsel %vm878_vm5, %v869_v34, %v877_v35 }
 0x2ea   :  { %881 = vst [vmem:[#allocation2] sm:$0xf] %v879_v36 }
 0x2eb   :  { %1186 = shalt.err (!%p1183_p4)
}
 0x2ec   :  { %s1187_s29 = scalar_lea.hbm %s1449_s7, 64 }
 0x2ed   :  { %p1188_p5 = scmp.ne.s32.totalorder %s1449_s7, %s1187_s29  ;;  %p1191_p6 = scmp.lt.u32.totalorder %s1187_s29, %s1449_s7 }
 0x2ef   :  { %p1193_p7 = pnand %p1191_p6, %p1188_p5 }
 0x2f1   :  { %1196 = shalt.err (!%p1193_p7)
}
 0x2f2   :  { %891 = dma.vmem_to_hbm [thread:$0]  %s889_s26, 64, %s1449_s7, [#allocation3]  }
 0x2f3   :  { %1197 = dma.done.wait [#allocation3], 64  }
 0x2f4   :  { %1198 = vsyncadd [#allocation3], 4294967232 }
 0x2f5   :  { %895 = vsyncpa [#allocation3], 1 }

</bundles_post_ra>
